<compile_context>
chip_gen: v5e
topology: v5e:2x2
jax: 0.10.0
libtpu: 0.0.40
codegen_flags: <defaults>
</compile_context>

<pallas_src>
import jax
import jax.numpy as jnp
from jax import lax
from jax.experimental import pallas as pl
from jax.experimental.pallas import tpu as pltpu


def gat_kernel(x_ref, graph_ref, w_ref, b_ref, o_ref):
    # x_ref:     (TB*N, C)  input features, batch folded into the MXU M dim
    # graph_ref: (N, N)     raw adjacency values (resident, constant index map)
    # w_ref:     (C, D)     W^T so that h = x @ w
    # b_ref:     (1, D)     bias
    # o_ref:     (TB, N, D) output tile
    tb, n, d = o_ref.shape

    # h = W(inputs): one (TB*N, C) @ (C, D) matmul.  HIGHEST keeps the
    # contraction in true f32 — the softmax exp() amplifies any truncation.
    h2 = jnp.dot(x_ref[...], w_ref[...],
                 precision=lax.Precision.HIGHEST,
                 preferred_element_type=jnp.float32)            # (TB*N, D)
    h = h2.reshape(tb, n, d)

    # scores = bmm(h, h^T): contraction over the last dims, no materialized
    # transpose.
    raw = jnp.einsum("bqd,bkd->bqk", h, h,
                     precision=lax.Precision.HIGHEST,
                     preferred_element_type=jnp.float32)        # (TB, N, N)

    # torch: graph = where(graph > 0, 1, 0); s = raw * graph;
    #        s.masked_fill_(s == 0, -1e16)
    # Direct-select equivalent (bit-identical for finite raw): fill where
    # there is no edge OR the raw score on an edge is exactly 0.
    no_edge = graph_ref[...] <= 0.0                             # (N, N) bool
    scores = jnp.where(no_edge[None] | (raw == 0.0),
                       jnp.float32(-1e16), raw)

    # softmax over the key dim (exact division: denom is only TB*N elements;
    # the approximate EUP reciprocal is not accurate enough for tight parity).
    m = jnp.max(scores, axis=-1, keepdims=True)
    e = jnp.exp(scores - m)
    denom = jnp.sum(e, axis=-1, keepdims=True)
    attn = e / denom

    # out = bmm(attention, h) + b
    out = jnp.einsum("bqk,bkd->bqd", attn, h,
                     precision=lax.Precision.HIGHEST,
                     preferred_element_type=jnp.float32)        # (TB, N, D)
    o_ref[...] = (out + b_ref[...]).astype(o_ref.dtype)

    # TODO(synk): for production N (>=512 on v5e/v6e, ~half that on v7x's
    # 64 MiB VMEM) add a query-row grid axis with a resident h scratch and
    # flash-style online softmax so the (TB, N, N) scores never materialize;
    # at that point also cast the two score/attn matmuls to bf16 (f32 accum)
    # on v6e/v7x — the direct mask select above no longer depends on exact
    # f32 products, only the test-parity here keeps them f32.


def _footprint_bytes(tb, N, C, D):
    """Rough live-VMEM estimate for one grid step (f32)."""
    io = 2 * tb * N * (C + 2 * D) * 4          # double-buffered x / out + h
    temps = 3 * tb * N * N * 4                 # raw / scores / e live set
    resident = 2 * (N * N + C * D + D) * 4     # mask, w, b (double-buffered)
    return io + temps + resident


def _pick_tb(B, N, C, D, *, target_rows=256, vmem_budget=24 << 20):
    """Batch-fold factor: fill the MXU M dimension (>=256 rows on v6e/v7x)
    while (a) keeping the (TB,N,N) temps inside a v7x-safe VMEM budget and
    (b) preferring >= 2 grid steps so the parallel grid axis can shard across
    v7x's two TensorCores."""
    divisors = [t for t in range(1, B + 1) if B % t == 0]
    fitting = [t for t in divisors if _footprint_bytes(t, N, C, D) <= vmem_budget] or [1]
    pref = [t for t in fitting if B // t >= 2] or fitting   # >=2 steps if possible
    reaching = [t for t in pref if t * N >= target_rows]
    return min(reaching) if reaching else max(pref)


def gat_forward(x, graph, w_t, b, *, tb=None):
    """x: [B, N, C] f32, graph: [N, N] f32, w_t: [C, D] f32, b: [D] f32."""
    B, N, C = x.shape
    D = w_t.shape[1]

    if tb is None:
        tb = _pick_tb(B, N, C, D)
    assert B % tb == 0

    x2 = x.reshape(B * N, C)                    # fold batch into M (wrapper-side)
    b2 = b.reshape(1, D)
    vmem_limit = int(min(48 << 20, max(32 << 20, 2 * _footprint_bytes(tb, N, C, D))))

    out = pl.pallas_call(
        gat_kernel,
        out_shape=jax.ShapeDtypeStruct((B, N, D), x.dtype),
        grid=(B // tb,),
        in_specs=[
            pl.BlockSpec((tb * N, C), lambda i: (i, 0)),
            # Resident, constant-index-map operands.
            # TODO(synk): at production N on v7x add pipeline_mode=pl.Buffered(1)
            # to these three specs so they are not pointlessly double-buffered.
            pl.BlockSpec((N, N), lambda i: (0, 0)),
            pl.BlockSpec((C, D), lambda i: (0, 0)),
            pl.BlockSpec((1, D), lambda i: (0, 0)),
        ],
        out_specs=pl.BlockSpec((tb, N, D), lambda i: (i, 0, 0)),
        compiler_params=pltpu.CompilerParams(
            dimension_semantics=("parallel",),
            vmem_limit_bytes=vmem_limit),
    )(x2, graph, w_t, b2)
    return out


def gat_reference(x, graph, w_t, b):
    """Pure-JAX reference mirroring the PyTorch forward exactly.

    Precision.HIGHEST everywhere: XLA's DEFAULT f32 matmul precision on TPU is
    bf16-truncated, and the exp() in the softmax amplifies that into O(10%)
    attention errors at these score magnitudes."""
    mask = jnp.where(graph > 0, 1.0, 0.0).astype(jnp.float32)
    h = jnp.einsum("bnc,cd->bnd", x, w_t, precision=lax.Precision.HIGHEST)
    scores = jnp.einsum("bnd,bmd->bnm", h, h,
                        precision=lax.Precision.HIGHEST) * mask[None]
    scores = jnp.where(scores == 0.0, jnp.float32(-1e16), scores)
    attn = jax.nn.softmax(scores, axis=2)
    return jnp.einsum("bnm,bmd->bnd", attn, h,
                      precision=lax.Precision.HIGHEST) + b


if __name__ == "__main__":
    B, N, C, D = 2, 8, 4, 32   # in_c=4, out_c=32

    key = jax.random.PRNGKey(0)
    k_x, k_g, k_w, k_b = jax.random.split(key, 4)

    x = jax.random.normal(k_x, (B, N, C), dtype=jnp.float32)
    # random sparse-ish adjacency (values > 0 become edges)
    graph = jax.random.uniform(k_g, (N, N), dtype=jnp.float32) - 0.4
    graph = jnp.maximum(graph, 0.0)

    # nn.init.normal_ on W ([out_c, in_c]) and b ([out_c]); store W transposed.
    w_torch = jax.random.normal(k_w, (D, C), dtype=jnp.float32)
    w_t = w_torch.T                      # [C, D]
    b = jax.random.normal(k_b, (D,), dtype=jnp.float32)

    out = gat_forward(x, graph, w_t, b)
    out = jax.block_until_ready(out)

    ref = gat_reference(x, graph, w_t, b)
    assert out.shape == (B, N, D)
    assert jnp.allclose(out, ref, atol=2e-3, rtol=2e-3), "mismatch vs reference"

    print("KERNEL_OK")
</pallas_src>

<mosaic_0001>
module attributes {stable_mosaic.version = 11 : i64} {
  func.func @gat_kernel(%arg0: i32, %arg1: memref<8x4xf32, #tpu.memory_space<vmem>>, %arg2: memref<8x8xf32, #tpu.memory_space<vmem>>, %arg3: memref<4x32xf32, #tpu.memory_space<vmem>>, %arg4: memref<1x32xf32, #tpu.memory_space<vmem>>, %arg5: memref<1x8x32xf32, #tpu.memory_space<vmem>>) attributes {dimension_semantics = [#tpu.dimension_semantics<parallel>], iteration_bounds = array<i64: 2>, scalar_prefetch = 0 : i64, scratch_operands = 0 : i64, tpu.core_type = #tpu.core_type<tc>, window_params = [{transform_indices = @transform_0, window_bounds = array<i64: 8, 4>}, {pipeline_mode = #tpu.pipeline_mode<synchronous>, transform_indices = @transform_1, window_bounds = array<i64: 8, 8>}, {pipeline_mode = #tpu.pipeline_mode<synchronous>, transform_indices = @transform_2, window_bounds = array<i64: 4, 32>}, {pipeline_mode = #tpu.pipeline_mode<synchronous>, transform_indices = @transform_3, window_bounds = array<i64: 1, 32>}, {transform_indices = @transform_4, window_bounds = array<i64: 1, 8, 32>}]} {
    %c0 = arith.constant 0 : index
    %c0_0 = arith.constant 0 : index
    %0 = vector.load %arg1[%c0, %c0_0] : memref<8x4xf32, #tpu.memory_space<vmem>>, vector<8x4xf32>
    %c0_1 = arith.constant 0 : index
    %c0_2 = arith.constant 0 : index
    %1 = vector.load %arg3[%c0_1, %c0_2] : memref<4x32xf32, #tpu.memory_space<vmem>>, vector<4x32xf32>
    %cst = arith.constant dense<0.000000e+00> : vector<8x32xf32>
    %2 = tpu.matmul %0, %1, %cst {dimension_numbers = #tpu.dot_dimension_numbers<[1], [0], [0], [1], [0, 0, 1, 1], [], []>, precision = #tpu.contract_precision<fp32>} : vector<8x4xf32>, vector<4x32xf32>, vector<8x32xf32> -> vector<8x32xf32>
    %3 = vector.shape_cast %2 : vector<8x32xf32> to vector<1x8x32xf32>
    "tpu.trace_start"() <{level = 10 : i32, message = "bqd,bkd->bqk"}> : () -> ()
    %cst_3 = arith.constant dense<0.000000e+00> : vector<1x8x8xf32>
    %4 = tpu.matmul %3, %3, %cst_3 {dimension_numbers = #tpu.dot_dimension_numbers<[2], [2], [1], [1], [0, 0, 0, 1, 1, 1], [0], [0]>, precision = #tpu.contract_precision<fp32>} : vector<1x8x32xf32>, vector<1x8x32xf32>, vector<1x8x8xf32> -> vector<1x8x8xf32>
    "tpu.trace_stop"() : () -> ()
    %c0_4 = arith.constant 0 : index
    %c0_5 = arith.constant 0 : index
    %5 = vector.load %arg2[%c0_4, %c0_5] : memref<8x8xf32, #tpu.memory_space<vmem>>, vector<8x8xf32>
    %cst_6 = arith.constant 0.000000e+00 : f32
    %6 = vector.broadcast %cst_6 : f32 to vector<8x8xf32>
    %7 = arith.cmpf ole, %5, %6 : vector<8x8xf32>
    %8 = vector.shape_cast %7 : vector<8x8xi1> to vector<1x8x8xi1>
    %cst_7 = arith.constant 0.000000e+00 : f32
    %9 = vector.broadcast %cst_7 : f32 to vector<1x8x8xf32>
    %10 = arith.cmpf oeq, %4, %9 : vector<1x8x8xf32>
    %11 = arith.ori %8, %10 : vector<1x8x8xi1>
    %cst_8 = arith.constant -1.000000e+16 : f32
    %12 = vector.broadcast %cst_8 : f32 to vector<1x8x8xf32>
    %13 = arith.select %11, %12, %4 : vector<1x8x8xi1>, vector<1x8x8xf32>
    %cst_9 = arith.constant dense<0xFF800000> : vector<1x8xf32>
    %14 = vector.multi_reduction <maximumf>, %13, %cst_9 [2] : vector<1x8x8xf32> to vector<1x8xf32>
    %15 = vector.shape_cast %14 : vector<1x8xf32> to vector<1x8x1xf32>
    %16 = vector.broadcast %15 : vector<1x8x1xf32> to vector<1x8x8xf32>
    %17 = arith.subf %13, %16 : vector<1x8x8xf32>
    %18 = math.exp %17 : vector<1x8x8xf32>
    %cst_10 = arith.constant dense<0.000000e+00> : vector<1x8xf32>
    %19 = vector.multi_reduction <add>, %18, %cst_10 [2] : vector<1x8x8xf32> to vector<1x8xf32>
    %20 = vector.shape_cast %19 : vector<1x8xf32> to vector<1x8x1xf32>
    %21 = vector.broadcast %20 : vector<1x8x1xf32> to vector<1x8x8xf32>
    %22 = arith.divf %18, %21 : vector<1x8x8xf32>
    "tpu.trace_start"() <{level = 10 : i32, message = "bqk,bkd->bqd"}> : () -> ()
    %cst_11 = arith.constant dense<0.000000e+00> : vector<1x8x32xf32>
    %23 = tpu.matmul %22, %3, %cst_11 {dimension_numbers = #tpu.dot_dimension_numbers<[2], [1], [1], [2], [0, 0, 0, 1, 1, 2], [0], [0]>, precision = #tpu.contract_precision<fp32>} : vector<1x8x8xf32>, vector<1x8x32xf32>, vector<1x8x32xf32> -> vector<1x8x32xf32>
    "tpu.trace_stop"() : () -> ()
    %c0_12 = arith.constant 0 : index
    %c0_13 = arith.constant 0 : index
    %24 = vector.load %arg4[%c0_12, %c0_13] : memref<1x32xf32, #tpu.memory_space<vmem>>, vector<1x32xf32>
    %25 = vector.shape_cast %24 : vector<1x32xf32> to vector<1x1x32xf32>
    %26 = vector.broadcast %25 : vector<1x1x32xf32> to vector<1x8x32xf32>
    %27 = arith.addf %23, %26 : vector<1x8x32xf32>
    %c0_14 = arith.constant 0 : index
    %c0_15 = arith.constant 0 : index
    %c0_16 = arith.constant 0 : index
    %28 = vector.load %arg5[%c0_14, %c0_15, %c0_16] : memref<1x8x32xf32, #tpu.memory_space<vmem>>, vector<1x8x32xf32>
    tpu.vector_store %arg5[%c0_14, %c0_15, %c0_16], %27 {strides = array<i32>} : memref<1x8x32xf32, #tpu.memory_space<vmem>>, vector<1x8x32xf32>,
    return
  }
  func.func @transform_0(%arg0: i32) -> (i32, i32) {
    %c0_i32 = arith.constant 0 : i32
    %c0_i32_0 = arith.constant 0 : i32
    return %arg0, %c0_i32 : i32, i32
  }
  func.func @transform_1(%arg0: i32) -> (i32, i32) {
    %c0_i32 = arith.constant 0 : i32
    %c0_i32_0 = arith.constant 0 : i32
    %c0_i32_1 = arith.constant 0 : i32
    return %c0_i32, %c0_i32_0 : i32, i32
  }
  func.func @transform_2(%arg0: i32) -> (i32, i32) {
    %c0_i32 = arith.constant 0 : i32
    %c0_i32_0 = arith.constant 0 : i32
    %c0_i32_1 = arith.constant 0 : i32
    return %c0_i32, %c0_i32_0 : i32, i32
  }
  func.func @transform_3(%arg0: i32) -> (i32, i32) {
    %c0_i32 = arith.constant 0 : i32
    %c0_i32_0 = arith.constant 0 : i32
    %c0_i32_1 = arith.constant 0 : i32
    return %c0_i32, %c0_i32_0 : i32, i32
  }
  func.func @transform_4(%arg0: i32) -> (i32, i32, i32) {
    %c0_i32 = arith.constant 0 : i32
    %c0_i32_0 = arith.constant 0 : i32
    %c0_i32_1 = arith.constant 0 : i32
    return %arg0, %c0_i32, %c0_i32_0 : i32, i32, i32
  }
}

</mosaic_0001>

<bundles_post_ra>
// kernel: tpu_custom_call.1
= control target key start
LH: loop header
LB: loop body
LE: loop exit
PB: predicated region body
PF: predicated region fallthrough
CT: control target
= control target key end

     0   :  { %9 = vsyncpa [#allocation3], 0  ;;  %s1000_s0 = inlined_call_operand.vmem [shape: f32[16,4], index: 0, kind: input, shape index: {}]   ;;  %s1001_s1 = inlined_call_operand.vmem [shape: f32[8,8], index: 1, kind: input, shape index: {}]   ;;  %s1002_s2 = inlined_call_operand.vmem [shape: f32[4,32], index: 2, kind: input, shape index: {}]   ;;  %s1003_s3 = inlined_call_operand.vmem [shape: f32[1,32], index: 3, kind: input, shape index: {}]   ;;  %s1004_s4 = inlined_call_operand.hbm [shape: f32[2,8,32], index: 4, kind: output, shape index: {}]  }
   0x1   :  { %11 = vsyncpa [#allocation3 + $0x1], 0  ;;  %s901_s15 = smov 0   ;;  %s903_s16 = smov 0  }
   0x2   :  { %s905_s17 = smov 0   ;;  %s907_s18 = smov 0  }
   0x3 LB: > { %s922_s19 = sadd.s32 4294967295, %s874_s18   ;;  %s758_s20 = sadd.s32 4294967294, %s874_s18   ;;  %s874_s18 = sphi %s907_s18, %s1010_s18   ;;  %s870_s17 = sphi %s905_s17, %s1009_s17   ;;  %s866_s16 = sphi %s903_s16, %s1008_s16   ;;  %s862_s15 = sphi %s901_s15, %s1007_s15  }
   0x4   : > { %s926_s21 = sadd.s32 1, %s874_s18   ;;  %s113_s22 = sadd.s32 1, %s870_s17 }
   0x5   : > { %s110_s23 = ssub.s32 %s874_s18, %s926_s21  ;;  %p123_p0 = scmp.ne.s32.totalorder %s870_s17, %s866_s16 }
   0x6   : > { %p111_p1 = scmp.eq.s32.totalorder %s110_s23, 0  ;;  %p124_p2 = scmp.eq.s32.totalorder %s922_s19, 1 }
   0x7   : > { %p129_p3 = scmp.ne.s32.totalorder %s866_s16, %s862_s15  ;;  %p130_p4 = scmp.eq.s32.totalorder %s758_s20, 1 }
   0x8   : > { %s937_s24 = scalar_select %p111_p1, %s870_s17, %s113_s22  }
   0x9   : > { %p939_p5 = por %p124_p2, %p123_p0  ;;  %p943_p6 = por %p130_p4, %p129_p3 }
   0xa   : > { %p761_p7 = scmp.ge.s32.totalorder %s874_s18, 1  ;;  %p164_p8 = scmp.lt.s32.totalorder %s874_s18, 3 }
   0xc   : > { %p165_p9 = pnand %p761_p7, %p164_p8 }
   0xd   : > { %p189_p10 = scmp.lt.s32.totalorder (!%p165_p9), %s922_s19, 1  ;;  %s186_s12 = sand.u32 (!%p165_p9), 1, %s866_s16  }
   0xe   : > { %168 = sbr.rel (%p165_p9) target bundleno = 749 (0x2ed), region = 36  ;;  %s762_s13 = sshll.u32 (!%p165_p9), %s186_s12, 3 }
   0xf   : > { %s765_s14 = sshll.u32 (!%p165_p9), %s922_s19, 3  ;;  %s188_s27 = scalar_lea.vmem (!%p165_p9), [#allocation2], %s762_s13 }
  0x10   : > { %s694_s23 = scalar_lea.hbm (!%p165_p9), %s1004_s4, %s765_s14  ;;  %s696_s28 = sshll.u32 (!%p165_p9), %s188_s27, 4  ;;  %s697_s28 = int_to_ptr.vmem [resolvable:$true] %s696_s28 }
  0x11   : > { %s832_s8 = scalar_lea.hbm (!%p165_p9), %s1004_s4, 16 }
  0x13   : > { %v194_v0 = vld [vmem:[%s1002_s2] sm:$0xf]  ;;  %vm199_vm0 = vcmask 1043456   ;;  %s190_s29 = scalar_select %p189_p10, %s922_s19, 1  ;;  %vm195_vm1 = vcmask 31744   ;;  %vm349_vm2 = vcmask 261120  }
  0x14   : > { %v201_v1 = vsel %vm199_vm0, %v194_v0, 0  ;;  %v499_v44 = vld [vmem:[%s1001_s1] sm:$0xff]  ;;  %vm504_vm5 = vcmask 64512   ;;  %s684_s19 = scalar_lea.sflag [#allocation3], %s186_s12 }
  0x15   : > { %v218_v2 = vand.u32 4294901760, %v201_v1  ;;  %s763_s30 = sshll.u32 %s190_s29, 3  ;;  %vm500_vm3 = vcmp.le.f32.partialorder %v499_v44, 0.0  ;;  %s698_s29 = sshll.u32 %s694_s23, 4  ;;  %s699_s29 = int_to_ptr.hbm [resolvable:$true] %s698_s29 }
  0x16   : > { %s192_s7 = scalar_lea.vmem %s1000_s0, %s763_s30  ;;  %s826_s30 = sshra.s32 %s699_s29, 4  ;;  %s827_s30 = int_to_ptr.hbm [resolvable:$true] %s826_s30 }
  0x17   : > { %v245_v3 = vsub.f32 %v201_v1, %v218_v2  ;;  %295 = vmatpush.msra.mxu3 %v218_v2  ;;  %219 = vmatpush.msra.mxu0 %v218_v2  ;;  %v193_v4 = vld [vmem:[%s192_s7] sm:$0xff]  ;;  %s828_s5 = scalar_lea.hbm %s827_s30, 8  ;;  %p833_p0 = scmp.lt.s32.totalorder %s827_s30, %s1004_s4 }
  0x18   : > { %v197_v6 = vsel %vm195_vm1, %v193_v4, 0  ;;  %p829_p11 = scmp.ne.s32.totalorder %s827_s30, %s828_s5  ;;  %p834_p1 = scmp.lt.s32.totalorder %s832_s8, %s828_s5 }
  0x19   : > { %272 = vmatpush.msra.mxu2 %v245_v3  ;;  %v246_v5 = vand.u32 4294901760, %v245_v3  ;;  %v220_v7 = vand.u32 4294901760, %v197_v6 }
  0x1a   : > { %p830_p12 = pnand %p829_p11, %p939_p5  ;;  %p835_p2 = por %p834_p1, %p833_p0 }
  0x1b   : > { %v247_v8 = vsub.f32 %v245_v3, %v246_v5  ;;  %321 = vmatpush.msrb.mxu0 %v246_v5  ;;  %v221_v9 = vsub.f32 %v197_v6, %v220_v7 }
  0x1c   : > { %p831_p13 = pneg %p830_p12 }
  0x1d   : > { %v248_v10 = vand.u32 4294901760, %v247_v8  ;;  %275 = vmatmul.f32.vlgmr.msra.gmra.mxu2 %v221_v9  ;;  %v222_v11 = vand.u32 4294901760, %v221_v9 }
  0x1e   : > { %p836_p3 = pnand %p835_p2, %p831_p13 }
  0x1f   : > { %249 = vmatpush.msra.mxu1 %v248_v10  ;;  %299 = vmatmul.f32.vlgmr.msra.gmra.mxu3 %v222_v11  ;;  %v223_v12 = vsub.f32 %v221_v9, %v222_v11  ;;  %v807_v9 = vld [vmem:[%s1003_s3] ss:$0 sm:$0xff] }
  0x20   : > { %251 = vmatmul.f32.vlgmr.msra.gmra.mxu1 %v220_v7 }
  0x21   : > { %343 = vmatpush.msrb.mxu1 %v218_v2  ;;  %v224_v13 = vand.u32 4294901760, %v223_v12 }
  0x23   : > { %225 = vmatmul.f32.vlgmr.msra.gmra.mxu0 %v224_v13 }
  0x28   : > { %345 = vmatmul.f32.vlgmr.msrb.gmra.mxu1 %v220_v7 }
  0x2b   : > { %323 = vmatmul.f32.vlgmr.msrb.gmra.mxu0 %v220_v7 }
  0x9d   : > { %v252_v14 = vpop.f32.mrf.mxu1 }
  0xa0   : > { %v226_v15 = vpop.f32.mrf.mxu0  ;;  %v276_v16 = vpop.f32.mrf.mxu2 }
  0xa1   : > { %v253_v17 = vadd.f32 %v252_v14, %v226_v15 }
  0xa2   : > { %v300_v19 = vpop.f32.mrf.mxu3 }
  0xa3   : > { %v277_v18 = vadd.f32 %v276_v16, %v253_v17 }
  0xa5   : > { %v301_v20 = vadd.f32 %v300_v19, %v277_v18  ;;  %v346_v22 = vpop.f32.mrf.mxu1 }
  0xa8   : > { %v324_v21 = vpop.f32.mrf.mxu0 }
  0xa9   : > { %v325_v23 = vadd.f32 %v324_v21, %v301_v20 }
  0xab   : > { %v347_v24 = vadd.f32 %v346_v22, %v325_v23 }
  0xad   : > { %v351_v25 = vsel %vm349_vm2, %v347_v24, 0  ;;  %v551_v26 = vand.u32 4294901760, %v347_v24 }
  0xae   : > { %v368_v27 = vand.u32 4294901760, %v351_v25 }
  0xaf   : > { %v578_v28 = vsub.f32 %v347_v24, %v551_v26 }
  0xb0   : > { %v371_v29 = vsub.f32 %v351_v25, %v368_v27  ;;  %369 = vmatpush.xpose.msrb.mxu2 %v368_v27  ;;  %445 = vmatpush.xpose.msra.mxu1 %v368_v27 }
  0xb1   : > { %v579_v30 = vand.u32 4294901760, %v578_v28 }
  0xb2   : > { %422 = vmatpush.xpose.msra.mxu0 %v371_v29  ;;  %v372_v31 = vand.u32 4294901760, %v371_v29 }
  0xb3   : > { %v580_v32 = vsub.f32 %v578_v28, %v579_v30 }
  0xb4   : > { %449 = vmatmul.f32.vlgmr.msra.gmra.mxu1 %v372_v31  ;;  %471 = vmatpush.xpose.msra.mxu2 %v372_v31  ;;  %v373_v33 = vsub.f32 %v371_v29, %v372_v31 }
  0xb5   : > { %425 = vmatmul.f32.vlgmr.msra.gmra.mxu0 %v371_v29  ;;  %v581_v34 = vand.u32 4294901760, %v580_v32 }
  0xb6   : > { %552 = vmatpush.msrb.mxu0 %v551_v26  ;;  %v374_v35 = vand.u32 4294901760, %v373_v33 }
  0xb7   : > { %582 = vmatpush.msrb.mxu1 %v581_v34 }
  0xb8   : > { %654 = vmatpush.msra.mxu0 %v579_v30  ;;  %375 = vmatmul.f32.vlgmr.msrb.gmra.mxu2 %v374_v35 }
  0xb9   : > { %399 = vmatpush.xpose.msrb.mxu3 %v374_v35  ;;  %605 = vmatpush.msrb.mxu2 %v578_v28 }
  0xba   : > { %676 = vmatpush.msra.mxu1 %v551_v26 }
  0xbc   : > { %401 = vmatmul.f32.vlgmr.msrb.gmra.mxu3 %v368_v27 }
  0xbd   : > { %493 = vmatpush.xpose.msra.mxu3 %v368_v27 }
  0xc0   : > { %473 = vmatmul.f32.vlgmr.msra.gmra.mxu2 %v368_v27 }
  0xc1   : > { %628 = vmatpush.msrb.mxu3 %v551_v26 }
  0xc4   : > { %495 = vmatmul.f32.vlgmr.msra.gmra.mxu3 %v368_v27 }
 0x131   : > { %v450_v41 = vpop.f32.mrf.mxu1 }
 0x132   : > { %v426_v39 = vpop.f32.mrf.mxu0 }
 0x13b   : > { %v376_v36 = vpop.f32.mrf.mxu2 }
 0x13f   : > { %v402_v37 = vpop.f32.mrf.mxu3 }
 0x140   : > { %v403_v38 = vadd.f32 %v402_v37, %v376_v36 }
 0x142   : > { %v427_v40 = vadd.f32 %v426_v39, %v403_v38 }
 0x143   : > { %v474_v43 = vpop.f32.mrf.mxu2 }
 0x144   : > { %v451_v42 = vadd.f32 %v450_v41, %v427_v40 }
 0x146   : > { %v475_v45 = vadd.f32 %v474_v43, %v451_v42 }
 0x147   : > { %v496_v46 = vpop.f32.mrf.mxu3 }
 0x148   : > { %v497_v47 = vadd.f32 %v496_v46, %v475_v45 }
 0x14a   : > { %vm501_vm4 = vcmp.eq.f32.partialorder %v497_v47, 0.0 }
 0x14b   : > { %vm502_vm6 = vmor %vm500_vm3, %vm501_vm4 }
 0x14c   : > { %v503_v48 = vsel %vm502_vm6, -1e+16, %v497_v47 }
 0x14d   : > { %v505_v49 = vsel %vm504_vm5, %v503_v48, -inf }
 0x14e   : > { %506 = vmax.xlane.f32.xlu0 %v505_v49 }
 0x1c1   : > { %v507_v50 = vpop.xlane.xlu0 %506 }
 0x1c2   : > { %v508_v51 = vsub.f32 %v503_v48, %v507_v50 }
 0x1c4   : > { %v509_v52 = vmul.f32 1.442695, %v508_v51 }
 0x1c6   : > { %808 = vpow2.f32 %v509_v52 }
 0x1cc   : > { %v809_v53 = vpop.eup %808 }
 0x1cd   : > { %v511_v54 = vsel %vm504_vm5, %v809_v53, 0.0 }
 0x1ce   : > { %512 = vadd.xlane.f32.xlu0 %v511_v54 }
 0x241   : > { %v513_v55 = vpop.xlane.xlu0 %512 }
 0x242   : > { %810 = vrcp.f32 %v513_v55  ;;  %v525_v59 = vand.u32 2147483648, %v513_v55  ;;  %v523_v61 = vand.u32 2147483647, %v513_v55  ;;  %vm519_vm8 = vweird.f32 %v513_v55 }
 0x244   : > { %v526_v63 = vor.u32 1.1754944e-38, %v525_v59  ;;  %vm524_vm10 = vcmp.eq.f32.partialorder %v523_v61, 8.507059e+37 }
 0x248   : > { %v811_v56 = vpop.eup %810 }
 0x249   : > { %v515_v57 = vmul.f32 %v811_v56, %v513_v55  ;;  %vm520_vm7 = vweird.f32 %v811_v56 }
 0x24a   : > { %vm521_vm9 = vmor %vm519_vm8, %vm520_vm7 }
 0x24b   : > { %v516_v58 = vsub.f32 1.0, %v515_v57 }
 0x24d   : > { %v517_v60 = vmul.f32 %v811_v56, %v516_v58 }
 0x24f   : > { %v518_v62 = vadd.f32 %v811_v56, %v517_v60 }
 0x251   : > { %v522_v0 = vsel %vm521_vm9, %v811_v56, %v518_v62 }
 0x252   : > { %v527_v1 = vsel %vm524_vm10, %v526_v63, %v522_v0 }
 0x253   : > { %v528_v2 = vmul.f32 %v809_v53, %v527_v1 }
 0x255   : > { %v534_v3 = vsel %vm504_vm5, %v528_v2, 0 }
 0x256   : > { %v553_v4 = vand.u32 4294901760, %v534_v3 }
 0x258   : > { %584 = vmatmul.f32.vlgmr.msrb.gmra.mxu1 %v553_v4  ;;  %v554_v5 = vsub.f32 %v534_v3, %v553_v4 }
 0x25a   : > { %608 = vmatmul.f32.vlgmr.msrb.gmra.mxu2 %v554_v5  ;;  %v555_v6 = vand.u32 4294901760, %v554_v5 }
 0x25c   : > { %632 = vmatmul.f32.vlgmr.msrb.gmra.mxu3 %v555_v6  ;;  %v556_v7 = vsub.f32 %v554_v5, %v555_v6 }
 0x25e   : > { %v557_v8 = vand.u32 4294901760, %v556_v7 }
 0x260   : > { %558 = vmatmul.f32.vlgmr.msrb.gmra.mxu0 %v557_v8  ;;  %678 = vmatmul.f32.vlgmr.msra.gmra.mxu1 %v553_v4 }
 0x268   : > { %656 = vmatmul.f32.vlgmr.msra.gmra.mxu0 %v553_v4 }
 0x2d5   : > { %v585_v10 = vpop.f32.mrf.mxu1 }
 0x2dd   : > { %v559_v11 = vpop.f32.mrf.mxu0  ;;  %v609_v14 = vpop.f32.mrf.mxu2 }
 0x2de   : > { %v560_v12 = vadd.f32 %v807_v9, %v559_v11  ;;  %v679_v20 = vpop.f32.mrf.mxu1 }
 0x2df   : > { %v633_v16 = vpop.f32.mrf.mxu3 }
 0x2e0   : > { %v586_v13 = vadd.f32 %v585_v10, %v560_v12 }
 0x2e2   : > { %v610_v15 = vadd.f32 %v609_v14, %v586_v13 }
 0x2e4   : > { %v634_v17 = vadd.f32 %v633_v16, %v610_v15 }
 0x2e5   : > { %v657_v18 = vpop.f32.mrf.mxu0 }
 0x2e6   : > { %v658_v19 = vadd.f32 %v657_v18, %v634_v17 }
 0x2e8   : > { %v680_v21 = vadd.f32 %v679_v20, %v658_v19 }
 0x2ea   : > { %682 = vst.msk [vmem:[%s188_s27] sm:$0xff] %vm349_vm2, %v680_v21 }
 0x2eb   : > { %839 = shalt.err (!%p836_p3)
}
 0x2ec   : > { %768 = dma.vmem_to_hbm [thread:$0]  (%p939_p5), %s697_s28, 128, %s699_s29, %s684_s19  }
 0x2ed PF: > { %p774_p4 = scmp.ge.s32.totalorder %s874_s18, 2  ;;  %s710_s11 = sand.u32 1, %s862_s15  }
 0x2ee   : > { %s711_s12 = scalar_lea.sflag [#allocation3], %s710_s11 }
 0x2ef   : > { %p771_p7 = pnand %p774_p4, %p943_p6 }
 0x2f1   : > { %p772_p8 = pneg %p771_p7 }
 0x2f3   : > { %857 = dma.done.wait (%p772_p8), %s711_s12, 128  }
 0x2f4   : > { %859 = vsyncadd (%p772_p8), %s711_s12, 4294967168  ;;  %p14_p9 = scmp.ge.s32.totalorder %s926_s21, 4   ;;  %s1007_s15 = smov %s866_s16 }
 0x2f5   : > { %s1008_s16 = smov %s870_s17  ;;  %s1009_s17 = smov %s937_s24 }
 0x2f6   : > { %s1010_s18 = smov %s926_s21  ;;  %16 = sbr.rel (!%p14_p9) target bundleno = 3 (0x3), region = 71 }
 0x2fb   :  { %717 = vsyncpa [#allocation3], 1 }
 0x2fc   :  { %719 = vsyncpa [#allocation3 + $0x1], 1 }

</bundles_post_ra>
